<compile_context>
chip_gen: v6e
topology: v6e:2x2x1
jax: 0.10.0
libtpu: 0.0.40
codegen_flags: <defaults>
</compile_context>

<pallas_src>
import functools

import jax
import jax.numpy as jnp
from jax.experimental import pallas as pl
from jax.experimental.pallas import tpu as pltpu

ALPHA = 0.5   # `weight` in the PyTorch module
GAMMA = 3     # integer exponent -> repeated multiplies, never exp(gamma*log(x))


def _tpu_generation():
    """Best-effort TPU generation sniff (5 / 6 / 7, 0 = unknown)."""
    try:
        kind = jax.devices()[0].device_kind.lower()
    except Exception:
        return 0
    if "v7" in kind or "7x" in kind:
        return 7
    if "v6" in kind:
        return 6
    if "v5" in kind:
        return 5
    return 0


def _block_ce_sum(preds_ref, targets_ref, *, n_valid, block_rows):
    """Sum over the valid rows of this block of (logsumexp(row) - row[target])."""
    # DMA'd in native dtype; widen to f32 in-register (halves HBM traffic for bf16).
    preds = preds_ref[...].astype(jnp.float32)          # (bn, C)
    tgt = targets_ref[...]                               # (bn, 1) int32
    bn, c = preds.shape

    # Fused masked gather of the target logit (no one-hot f32 materialized matmul).
    # NOTE: an out-of-range target id silently yields tgt_logit = 0 (F.cross_entropy
    # would raise); behavioral difference only.
    col_ids = jax.lax.broadcasted_iota(jnp.int32, (bn, c), 1)
    tgt_logit = jnp.sum(jnp.where(col_ids == tgt, preds, 0.0),
                        axis=-1, keepdims=True)          # (bn, 1)

    # Numerically stable logsumexp over the class axis.
    # TODO(synk): stream logsumexp over a tiled class axis for vocab-scale C.
    m = jnp.max(preds, axis=-1, keepdims=True)
    lse = m + jnp.log(jnp.sum(jnp.exp(preds - m), axis=-1, keepdims=True))

    # Mask rows past the true batch size (ragged last block reads padded garbage).
    # jnp.where *selects*, so garbage/Inf/NaN in masked rows never contaminates.
    row_ids = (jax.lax.broadcasted_iota(jnp.int32, (bn, 1), 0)
               + pl.program_id(0) * block_rows)
    contrib = jnp.where(row_ids < n_valid, lse - tgt_logit, 0.0)
    return jnp.sum(contrib)


def _ce_partial_kernel(preds_ref, targets_ref, out_ref, *, n_valid, block_rows):
    """v7x path: one partial CE sum per grid step (independent -> megacore-parallel)."""
    s = _block_ce_sum(preds_ref, targets_ref, n_valid=n_valid, block_rows=block_rows)
    out_ref[...] = jnp.full(out_ref.shape, s, dtype=out_ref.dtype)


def _focal_fused_kernel(preds_ref, targets_ref, out_ref, *, n_valid, block_rows,
                        alpha, gamma):
    """Single-TensorCore path: accumulate CE in the resident (1,1) output block and
    apply the whole scalar epilogue (mean/exp/clamp/pow/scale) at the last step."""
    i = pl.program_id(0)

    @pl.when(i == 0)
    def _init():
        out_ref[...] = jnp.zeros_like(out_ref)

    out_ref[...] += _block_ce_sum(preds_ref, targets_ref,
                                  n_valid=n_valid, block_rows=block_rows)

    @pl.when(i == pl.num_programs(0) - 1)
    def _finalize():
        ce = out_ref[...] * jnp.float32(1.0 / n_valid)   # mean over the true batch
        pt = jnp.exp(-ce)
        om = jnp.maximum(1.0 - pt, 0.0)                  # clamp tiny negative residue
        omg = jnp.ones_like(om)
        for _ in range(int(gamma)):                      # integer power -> multiplies
            omg = omg * om
        out_ref[...] = (jnp.float32(alpha) * omg * ce).astype(out_ref.dtype)


def focal_loss(preds, targets, *, block_rows=None, alpha=ALPHA, gamma=GAMMA,
               multi_core=None):
    """preds: (N, C) logits (f32 or bf16); targets: (N,) int class ids -> scalar f32."""
    n, c = preds.shape
    targets2d = targets.reshape(n, 1).astype(jnp.int32)
    itemsize = jnp.dtype(preds.dtype).itemsize

    gen = _tpu_generation()
    if multi_core is None:
        multi_core = gen >= 7          # v7x: 2 TensorCores/chip -> shard the batch grid

    # Generation-aware VMEM sizing (v7x: 64 MiB physical / 32 MiB default scoped;
    # v5e/v6e: 128 MiB physical).  tile_budget = whole per-step working set target.
    if gen == 6:
        vmem_limit, tile_budget = 96 * 1024 * 1024, 64 * 1024 * 1024
    elif gen == 5:
        vmem_limit, tile_budget = 64 * 1024 * 1024, 32 * 1024 * 1024
    else:  # v7x or unknown: stay conservative
        vmem_limit, tile_budget = 48 * 1024 * 1024, 32 * 1024 * 1024

    if block_rows is None:
        # Per-row VMEM: 2x double-buffered native logits (lane-padded to >=128)
        # + ~5x full-size f32/i32 temps (astype copy, col iota, where-select, p-m, exp)
        # + 2x double-buffered (bn,1) int32 targets, lane-padded to 128 lanes.
        # (Targets kept (N,1): their padded cost is folded into this budget instead of
        #  a lane-dense (1,N) layout that would need an in-kernel lane->sublane relayout.)
        padded_c = ((c + 127) // 128) * 128
        bytes_per_row = padded_c * (2 * itemsize + 5 * 4) + 2 * 128 * 4
        block_rows = max(8, tile_budget // bytes_per_row)
        block_rows -= block_rows % 8
    if multi_core and n > 8:
        # Keep >= 2 grid blocks so the second v7x TensorCore has work.
        half = max(8, ((-(-n // 2) + 7) // 8) * 8)
        block_rows = min(block_rows, half)
    if block_rows >= n:
        block_rows = n                 # full-dim block (any n allowed)

    num_blocks = pl.cdiv(n, block_rows)
    cost = pl.CostEstimate(
        flops=int(5 * n * c),
        transcendentals=int(n * c + n),
        bytes_accessed=int(n * c * itemsize + 4 * n + 4 * num_blocks),
    )
    in_specs = [
        pl.BlockSpec((block_rows, c), lambda i: (i, 0)),
        pl.BlockSpec((block_rows, 1), lambda i: (i, 0)),
    ]

    if multi_core:
        # v7x: independent per-block partials; batch axis "parallel" so both
        # TensorCores stream HBM; trivial scalar epilogue stays in XLA.
        # TODO(synk): if a bundle dump shows the EUP exp slot binding for bf16 logits
        # on v7x, do the exp in bf16 (sum/log stay f32).
        kernel = functools.partial(_ce_partial_kernel, n_valid=n,
                                   block_rows=block_rows)
        partials = pl.pallas_call(
            kernel,
            out_shape=jax.ShapeDtypeStruct((num_blocks, 1, 1), jnp.float32),
            grid=(num_blocks,),
            in_specs=in_specs,
            out_specs=pl.BlockSpec((1, 1, 1), lambda i: (i, 0, 0)),
            compiler_params=pltpu.CompilerParams(
                dimension_semantics=("parallel",),
                vmem_limit_bytes=vmem_limit,
            ),
            cost_estimate=cost,
        )(preds, targets2d)
        ce = jnp.sum(partials) / jnp.float32(n)
        pt = jnp.exp(-ce)
        om = jnp.maximum(1.0 - pt, 0.0)
        return alpha * (om ** gamma) * ce

    # v5e / v6e / unknown (single TensorCore): fuse the cross-block reduction and the
    # scalar epilogue into the kernel -> one scalar output, no per-block writebacks.
    kernel = functools.partial(_focal_fused_kernel, n_valid=n,
                               block_rows=block_rows, alpha=alpha, gamma=gamma)
    out = pl.pallas_call(
        kernel,
        out_shape=jax.ShapeDtypeStruct((1, 1), jnp.float32),
        grid=(num_blocks,),
        in_specs=in_specs,
        out_specs=pl.BlockSpec((1, 1), lambda i: (0, 0)),
        compiler_params=pltpu.CompilerParams(
            dimension_semantics=("arbitrary",),
            vmem_limit_bytes=vmem_limit,
        ),
        cost_estimate=cost,
    )(preds, targets2d)
    return out[0, 0]


if __name__ == "__main__":
    key = jax.random.PRNGKey(0)
    k1, k2, k3, k4 = jax.random.split(key, 4)

    def reference(preds, targets):
        p = preds.astype(jnp.float32)
        lse = jax.nn.logsumexp(p, axis=-1)
        tl = jnp.take_along_axis(p, targets[:, None], axis=-1)[:, 0]
        ce = jnp.mean(lse - tl)
        pt = jnp.exp(-ce)
        return ALPHA * (1.0 - pt) ** GAMMA * ce

    # Case 1: small single-block batch, device-default path.
    N, C = 8, 32
    preds = jax.random.normal(k1, (N, C), dtype=jnp.float32)
    targets = jax.random.randint(k2, (N,), 0, C, dtype=jnp.int32)
    loss = focal_loss(preds, targets)
    jax.block_until_ready(loss)
    ref = reference(preds, targets)
    assert jnp.allclose(loss, ref, rtol=1e-5, atol=1e-5), (loss, ref)

    # Case 2: multi-block grid with a ragged last tile; exercise BOTH code paths
    # (fused single-core accumulator and v7x-style parallel partials) on any chip.
    N2, C2 = 20, 32
    preds2 = jax.random.normal(k3, (N2, C2), dtype=jnp.float32)
    targets2 = jax.random.randint(k4, (N2,), 0, C2, dtype=jnp.int32)
    ref2 = reference(preds2, targets2)
    for mc in (False, True):
        loss2 = focal_loss(preds2, targets2, block_rows=8, multi_core=mc)
        jax.block_until_ready(loss2)
        assert jnp.allclose(loss2, ref2, rtol=1e-5, atol=1e-5), (mc, loss2, ref2)

    # Case 3: bf16 logits exercise the in-register f32 widening path.
    preds3 = preds2.astype(jnp.bfloat16)
    loss3 = focal_loss(preds3, targets2, block_rows=8)
    jax.block_until_ready(loss3)
    ref3 = reference(preds3, targets2)
    assert jnp.allclose(loss3, ref3, rtol=5e-3, atol=5e-3), (loss3, ref3)

    print("KERNEL_OK")
</pallas_src>

<mosaic_0001>
module attributes {stable_mosaic.version = 11 : i64} {
  func.func @_focal_fused_kernel(%arg0: i32, %arg1: memref<8x32xf32, #tpu.memory_space<vmem>>, %arg2: memref<8x1xi32, #tpu.memory_space<vmem>>, %arg3: memref<1x1xf32, #tpu.memory_space<vmem>>) attributes {dimension_semantics = [#tpu.dimension_semantics<arbitrary>], iteration_bounds = array<i64: 1>, scalar_prefetch = 0 : i64, scratch_operands = 0 : i64, tpu.core_type = #tpu.core_type<tc>, window_params = [{transform_indices = @transform_0, window_bounds = array<i64: 8, 32>}, {transform_indices = @transform_1, window_bounds = array<i64: 8, 1>}, {pipeline_mode = #tpu.pipeline_mode<synchronous>, transform_indices = @transform_2, window_bounds = array<i64: 1, 1>}]} {
    %c0_i32 = arith.constant 0 : i32
    %0 = arith.cmpi eq, %arg0, %c0_i32 : i32
    %1 = arith.extui %0 : i1 to i32
    %c0_i32_0 = arith.constant 0 : i32
    %2 = arith.cmpi ne, %1, %c0_i32_0 : i32
    scf.if %2 {
      %cst_16 = arith.constant 0.000000e+00 : f32
      %41 = vector.broadcast %cst_16 : f32 to vector<1x1xf32>
      %c0_17 = arith.constant 0 : index
      %c0_18 = arith.constant 0 : index
      %42 = vector.load %arg3[%c0_17, %c0_18] : memref<1x1xf32, #tpu.memory_space<vmem>>, vector<1x1xf32>
      tpu.vector_store %arg3[%c0_17, %c0_18], %41 {strides = array<i32>} : memref<1x1xf32, #tpu.memory_space<vmem>>, vector<1x1xf32>,
    } else {
    }
    %c0 = arith.constant 0 : index
    %c0_1 = arith.constant 0 : index
    %3 = vector.load %arg3[%c0, %c0_1] : memref<1x1xf32, #tpu.memory_space<vmem>>, vector<1x1xf32>
    %c0_2 = arith.constant 0 : index
    %c0_3 = arith.constant 0 : index
    %4 = vector.load %arg1[%c0_2, %c0_3] : memref<8x32xf32, #tpu.memory_space<vmem>>, vector<8x32xf32>
    %c0_4 = arith.constant 0 : index
    %c0_5 = arith.constant 0 : index
    %5 = vector.load %arg2[%c0_4, %c0_5] : memref<8x1xi32, #tpu.memory_space<vmem>>, vector<8x1xi32>
    %6 = tpu.iota {dimensions = array<i32: 1>} : vector<8x32xi32>
    %7 = vector.broadcast %5 : vector<8x1xi32> to vector<8x32xi32>
    %8 = arith.cmpi eq, %6, %7 : vector<8x32xi32>
    %cst = arith.constant 0.000000e+00 : f32
    %9 = vector.broadcast %cst : f32 to vector<8x32xf32>
    %10 = arith.select %8, %4, %9 : vector<8x32xi1>, vector<8x32xf32>
    %cst_6 = arith.constant dense<0.000000e+00> : vector<8xf32>
    %11 = vector.multi_reduction <add>, %10, %cst_6 [1] : vector<8x32xf32> to vector<8xf32>
    %12 = vector.shape_cast %11 : vector<8xf32> to vector<8x1xf32>
    %cst_7 = arith.constant dense<0xFF800000> : vector<8xf32>
    %13 = vector.multi_reduction <maximumf>, %4, %cst_7 [1] : vector<8x32xf32> to vector<8xf32>
    %14 = vector.shape_cast %13 : vector<8xf32> to vector<8x1xf32>
    %15 = vector.broadcast %14 : vector<8x1xf32> to vector<8x32xf32>
    %16 = arith.subf %4, %15 : vector<8x32xf32>
    %17 = math.exp %16 : vector<8x32xf32>
    %cst_8 = arith.constant dense<0.000000e+00> : vector<8xf32>
    %18 = vector.multi_reduction <add>, %17, %cst_8 [1] : vector<8x32xf32> to vector<8xf32>
    %19 = vector.shape_cast %18 : vector<8xf32> to vector<8x1xf32>
    %20 = math.log %19 : vector<8x1xf32>
    %21 = arith.addf %14, %20 : vector<8x1xf32>
    %22 = tpu.iota {dimensions = array<i32: 0>} : vector<8x1xi32>
    %c8_i32 = arith.constant 8 : i32
    %23 = arith.muli %arg0, %c8_i32 : i32
    %24 = vector.broadcast %23 : i32 to vector<8x1xi32>
    %25 = arith.addi %22, %24 : vector<8x1xi32>
    %c8_i32_9 = arith.constant 8 : i32
    %26 = vector.broadcast %c8_i32_9 : i32 to vector<8x1xi32>
    %27 = arith.cmpi slt, %25, %26 : vector<8x1xi32>
    %28 = arith.subf %21, %12 : vector<8x1xf32>
    %cst_10 = arith.constant 0.000000e+00 : f32
    %29 = vector.broadcast %cst_10 : f32 to vector<8x1xf32>
    %30 = arith.select %27, %28, %29 : vector<8x1xi1>, vector<8x1xf32>
    %31 = vector.shape_cast %30 : vector<8x1xf32> to vector<1x8x1xf32>
    %cst_11 = arith.constant dense<0.000000e+00> : vector<1xf32>
    %32 = vector.multi_reduction <add>, %31, %cst_11 [1, 2] : vector<1x8x1xf32> to vector<1xf32>
    %33 = vector.shape_cast %32 : vector<1xf32> to vector<1x1x1xf32>
    %34 = vector.extract %33[0, 0, 0] : f32 from vector<1x1x1xf32>
    %35 = vector.broadcast %34 : f32 to vector<1x1xf32>
    %36 = arith.addf %3, %35 : vector<1x1xf32>
    %c0_12 = arith.constant 0 : index
    %c0_13 = arith.constant 0 : index
    %37 = vector.load %arg3[%c0_12, %c0_13] : memref<1x1xf32, #tpu.memory_space<vmem>>, vector<1x1xf32>
    tpu.vector_store %arg3[%c0_12, %c0_13], %36 {strides = array<i32>} : memref<1x1xf32, #tpu.memory_space<vmem>>, vector<1x1xf32>,
    %c0_i32_14 = arith.constant 0 : i32
    %38 = arith.cmpi eq, %arg0, %c0_i32_14 : i32
    %39 = arith.extui %38 : i1 to i32
    %c0_i32_15 = arith.constant 0 : i32
    %40 = arith.cmpi ne, %39, %c0_i32_15 : i32
    scf.if %40 {
      %c0_16 = arith.constant 0 : index
      %c0_17 = arith.constant 0 : index
      %41 = vector.load %arg3[%c0_16, %c0_17] : memref<1x1xf32, #tpu.memory_space<vmem>>, vector<1x1xf32>
      %cst_18 = arith.constant 1.250000e-01 : f32
      %42 = vector.broadcast %cst_18 : f32 to vector<1x1xf32>
      %43 = arith.mulf %41, %42 : vector<1x1xf32>
      %cst_19 = arith.constant 0.000000e+00 : f32
      %44 = vector.broadcast %cst_19 : f32 to vector<1x1xf32>
      %45 = arith.subf %44, %43 : vector<1x1xf32>
      %46 = math.exp %45 : vector<1x1xf32>
      %cst_20 = arith.constant 1.000000e+00 : f32
      %47 = vector.broadcast %cst_20 : f32 to vector<1x1xf32>
      %48 = arith.subf %47, %46 : vector<1x1xf32>
      %cst_21 = arith.constant 0.000000e+00 : f32
      %49 = vector.broadcast %cst_21 : f32 to vector<1x1xf32>
      %50 = arith.maximumf %48, %49 : vector<1x1xf32>
      %cst_22 = arith.constant 1.000000e+00 : f32
      %51 = vector.broadcast %cst_22 : f32 to vector<1x1xf32>
      %52 = arith.mulf %51, %50 : vector<1x1xf32>
      %53 = arith.mulf %52, %50 : vector<1x1xf32>
      %54 = arith.mulf %53, %50 : vector<1x1xf32>
      %cst_23 = arith.constant 5.000000e-01 : f32
      %55 = vector.broadcast %cst_23 : f32 to vector<1x1xf32>
      %56 = arith.mulf %55, %54 : vector<1x1xf32>
      %57 = arith.mulf %56, %43 : vector<1x1xf32>
      %c0_24 = arith.constant 0 : index
      %c0_25 = arith.constant 0 : index
      %58 = vector.load %arg3[%c0_24, %c0_25] : memref<1x1xf32, #tpu.memory_space<vmem>>, vector<1x1xf32>
      tpu.vector_store %arg3[%c0_24, %c0_25], %57 {strides = array<i32>} : memref<1x1xf32, #tpu.memory_space<vmem>>, vector<1x1xf32>,
    } else {
    }
    return
  }
  func.func @transform_0(%arg0: i32) -> (i32, i32) {
    %c0_i32 = arith.constant 0 : i32
    %c0_i32_0 = arith.constant 0 : i32
    return %arg0, %c0_i32 : i32, i32
  }
  func.func @transform_1(%arg0: i32) -> (i32, i32) {
    %c0_i32 = arith.constant 0 : i32
    %c0_i32_0 = arith.constant 0 : i32
    return %arg0, %c0_i32 : i32, i32
  }
  func.func @transform_2(%arg0: i32) -> (i32, i32) {
    %c0_i32 = arith.constant 0 : i32
    %c0_i32_0 = arith.constant 0 : i32
    %c0_i32_1 = arith.constant 0 : i32
    return %c0_i32, %c0_i32_0 : i32, i32
  }
}

</mosaic_0001>

<bundles_post_ra>
// kernel: tpu_custom_call.1
= control target key start
LH: loop header
LB: loop body
LE: loop exit
PB: predicated region body
PF: predicated region fallthrough
CT: control target
= control target key end

     0   :  { %vm28_vm0 = vcmask 261120   ;;  %s163_s0 = inlined_call_operand.vmem [shape: f32[8,32], index: 0, kind: input, shape index: {}]   ;;  %s164_s1 = inlined_call_operand.vmem [shape: s32[8,1], index: 1, kind: input, shape index: {}]   ;;  %s165_s2 = inlined_call_operand.hbm [shape: f32[1,1], index: 2, kind: output, shape index: {}]  }
   0x1   :  { %v19_v0 = vld [vmem:[%s163_s0] sm:$0xff] }
   0x2   :  { %7 = vsyncpa [#allocation3], 0  ;;  %v32_v1 = vsel %vm28_vm0, %v19_v0, -inf  ;;  %v130_v2 = vmov 0   ;;  %v20_v3 = vld [vmem:[%s164_s1] sm:$0xff]  ;;  %v21_v7 = vlaneseq  ;;  %vm52_vm2 = vcmask 7168  }
   0x3   :  { %101 = vset.pattern.permute.xlu0 %v130_v2  ;;  %vm16_vm3 = vcmask 0   ;;  %v131_v21 = vmov 0.0   ;;  %s132_s1 = smov [#allocation2]  }
   0x4   :  { %33 = vmax.xlane.f32.xlu0 %v32_v1  ;;  %v22_v8 = vand.u32 127, %v21_v7  ;;  %17 = vst.msk [vmem:[#allocation2] sm:$0x1] %vm16_vm3, %v131_v21  ;;  %s88_s13 = sshll.u32 %s132_s1, 4  ;;  %s89_s13 = int_to_ptr.vmem [resolvable:$true] %s88_s13 }
   0x5   :  { %s108_s14 = scalar_lea.vmem %s89_s13, 16  ;;  %s112_s15 = scalar_lea.vmem %s89_s13, 32 }
   0x6   :  { %p109_p0 = scmp.ne.s32.totalorder %s89_s13, %s108_s14  ;;  %p113_p1 = scmp.lt.s32.totalorder %s89_s13, %s89_s13 }
   0x7   :  { %p114_p2 = scmp.lt.s32.totalorder %s112_s15, %s108_s14 }
   0x9   :  { %p115_p3 = por %p114_p2, %p113_p1 }
   0xb   :  { %v18_v29 = vld [vmem:[#allocation2] sm:$0x1]  ;;  %p116_p4 = pnand %p115_p3, %p109_p0 }
  0x1a   :  { %24 = vperm.xlu0 %101, %v20_v3  }
  0x8d   :  { %v34_v4 = vpop.xlane.xlu0 %33 }
  0x8e   :  { %v35_v5 = vsub.f32 %v19_v0, %v34_v4 }
  0x90   :  { %v36_v6 = vmul.f32 1.442695, %v35_v5 }
  0x92   :  { %102 = vpow2.f32 %v36_v6 }
  0x95   :  { %v25_v9 = vpop.permute.xlu0 %24 }
  0x96   :  { %vm26_vm1 = vcmp.eq.s32.totalorder %v22_v8, %v25_v9 }
  0x97   :  { %v27_v11 = vsel %vm26_vm1, %v19_v0, 0.0 }
  0x98   :  { %v29_v13 = vsel %vm28_vm0, %v27_v11, 0.0 }
  0x9f   :  { %v103_v10 = vpop.eup %102 }
  0xa0   :  { %v38_v12 = vsel %vm28_vm0, %v103_v10, 0.0 }
  0xa1   :  { %39 = vadd.xlane.f32.xlu1 %v38_v12 }
  0xa5   :  { %30 = vadd.xlane.f32.xlu1 %v29_v13 }
 0x12a   :  { %v40_v14 = vpop.xlane.xlu1 %39 }
 0x12b   :  { %104 = vlog2.f32 %v40_v14 }
 0x12e   :  { %v31_v17 = vpop.xlane.xlu1 %30 }
 0x138   :  { %v105_v15 = vpop.eup %104 }
 0x139   :  { %v42_v16 = vmul.f32 0.6931472, %v105_v15 }
 0x13b   :  { %v43_v18 = vadd.f32 %v42_v16, %v34_v4 }
 0x13d   :  { %v50_v19 = vsub.f32 %v43_v18, %v31_v17 }
 0x13f   :  { %v53_v20 = vsel %vm52_vm2, %v50_v19, 0.0 }
 0x140   :  { %54 = vadd.xlane.f32.xlu1 %v53_v20 }
 0x1c9   :  { %v55_v22 = vpop.xlane.xlu1 %54 }
 0x1ca   :  { %v56_v23 = vrot.slane %v55_v22, 4 }
 0x1cc   :  { %v57_v24 = vadd.f32 %v56_v23, %v55_v22 }
 0x1ce   :  { %v58_v25 = vrot.slane %v57_v24, 2 }
 0x1d0   :  { %v59_v26 = vadd.f32 %v58_v25, %v57_v24 }
 0x1d2   :  { %v60_v27 = vrot.slane %v59_v26, 1 }
 0x1d4   :  { %v61_v28 = vadd.f32 %v60_v27, %v59_v26 }
 0x1d6   :  { %96 = vpush %v61_v28 }
 0x207   :  { %s97_s0 = spop %96 }
 0x208   :  { %v63_v30 = vstv %s97_s0 }
 0x209   :  { %v64_v31 = vadd.f32 %v63_v30, %v18_v29 }
 0x20b   :  { %66 = vst.msk [vmem:[#allocation2] sm:$0x1] %vm16_vm3, %v64_v31 }
 0x212   :  { %v70_v32 = vld [vmem:[#allocation2] sm:$0x1] }
 0x213   :  { %v71_v33 = vmul.f32 0.125, %v70_v32 }
 0x215   :  { %v72_v34 = vsub.f32 0.0, %v71_v33 }
 0x217   :  { %v73_v35 = vmul.f32 1.442695, %v72_v34 }
 0x219   :  { %106 = vpow2.f32 %v73_v35 }
 0x226   :  { %v107_v36 = vpop.eup %106 }
 0x227   :  { %v75_v37 = vsub.f32 1.0, %v107_v36 }
 0x229   :  { %v76_v38 = vmax.f32 %v75_v37, 0.0 }
 0x22b   :  { %v77_v39 = vmul.f32 %v76_v38, %v76_v38 }
 0x22d   :  { %v78_v40 = vmul.f32 %v77_v39, %v76_v38 }
 0x22f   :  { %v79_v41 = vmul.f32 0.5, %v78_v40 }
 0x231   :  { %v80_v42 = vmul.f32 %v79_v41, %v71_v33 }
 0x233   :  { %81 = vst.msk [vmem:[#allocation2] sm:$0x1] %vm16_vm3, %v80_v42 }
 0x234   :  { %119 = shalt.err (!%p116_p4)
}
 0x235   :  { %91 = dma.vmem_to_hbm [thread:$0]  %s89_s13, 16, %s165_s2, [#allocation3]  }
 0x236   :  { %128 = dma.done.wait [#allocation3], 16  }
 0x237   :  { %129 = vsyncadd [#allocation3], 4294967280 }
 0x238   :  { %95 = vsyncpa [#allocation3], 1 }

</bundles_post_ra>
